<compile_context>
chip_gen: v7x
topology: tpu7x:2x2x1
jax: 0.10.0
libtpu: 0.0.40
codegen_flags: <defaults>
</compile_context>

<pallas_src>
import functools

import jax
import jax.numpy as jnp
import numpy as np
from jax.experimental import pallas as pl
from jax.experimental.pallas import tpu as pltpu


def _round_up(x, m):
    return (x + m - 1) // m * m


def _pad_tile_bytes(rows, cols, itemsize):
    # VMEM buffers are laid out in (8, 128) tiles.
    return _round_up(max(rows, 1), 8) * _round_up(max(cols, 1), 128) * itemsize


def _hiervae_latent_kernel(TB, Q, L,
                           gf_ref, weff_ref, beff_ref, eps_ref,
                           txt_ref, wt_ref, bt_ref,
                           packed_ref):
    """One grid step: TB batch elements == TB*Q query rows.

    packed_ref[TB, PACK] layout (lane-dense, PACK a multiple of 128):
      [:, :L]    root_vecs (Q-mean of the reparameterized z)
      [:, L:2L]  text_rep
      [:, 2L:]   per-batch-row kl partial sum (broadcast across the pad lanes)
    """
    # Folded new_graph_proj -> (R_mean | R_var): ONE MXU push on the serial
    # latent chain.  Weff/beff are VMEM-resident across grid steps.
    zmzv = (jnp.dot(gf_ref[...], weff_ref[...],
                    preferred_element_type=jnp.float32)
            + beff_ref[...])                                          # [TB*Q, 2L] f32
    zm = zmzv[:, :L]                                                  # [TB*Q, L]
    zlv = -jnp.abs(zmzv[:, L:])                                       # [TB*Q, L]

    # Single EUP transcendental: e = exp(zlv/2); exp(zlv) = e*e (VPU).
    e = jnp.exp(0.5 * zlv)                                            # [TB*Q, L]

    # Raw per-element kl term; batch sum and -0.5/B scale happen in the
    # wrapper so the grid row axis stays fully "parallel" (v7x: both TCs).
    term = 1.0 + zlv - zm * zm - e * e                                # [TB*Q, L]

    # Reparameterization: z = z_mean + exp(z_log_var / 2) * epsilon
    z = zm + e * eps_ref[...]                                         # [TB*Q, L]

    # root_vecs.mean(dim=-2): Q=8 query rows per batch element == exactly one
    # sublane tile, so the reshape only splits the sublane axis (no lane
    # relayout) and the mean is a cheap sublane reduce.
    root = jnp.mean(z.reshape(TB, Q, L), axis=1)                      # [TB, L]

    # Per-batch-row kl partial: two last-axis (lane) reduces.
    klq = jnp.sum(term.reshape(TB, Q, L), axis=2)                     # [TB, Q]
    klb = jnp.sum(klq, axis=1, keepdims=True)                         # [TB, 1]

    # new_text_proj: Linear(text_hidden -> latent_size)
    trep = (jnp.dot(txt_ref[...], wt_ref[...],
                    preferred_element_type=jnp.float32)
            + bt_ref[...])                                            # [TB, L]

    # Lane-dense packed writeback: one unmasked full-tile store per step.
    pad = packed_ref.shape[-1] - 2 * L
    packed_ref[...] = jnp.concatenate(
        [root, trep, jnp.broadcast_to(klb, (TB, pad))], axis=-1)


def hiervae_latent(graph_feats_all, text_input, params, eps, *,
                   max_rows_per_tile=512, mxu_dtype=jnp.float32):
    """graph_feats_all: [B, Q, GH] f32, text_input: [B, TH] f32, eps: [B*Q, L] f32.

    Returns (root_vecs [B, L], kl scalar, text_rep [B, L]).
    """
    B, Q, GH = graph_feats_all.shape
    L = params["Wm"].shape[1]
    TH = params["Wt"].shape[0]
    BQ = B * Q

    # ---- batch tiling: TB batch elements (== TB*Q rows) per grid step --------
    TB = max(1, min(B, max_rows_per_tile // max(Q, 1)))
    while B % TB:
        TB -= 1
    grid = (B // TB,)

    # ---- fold the affine chain once in the wrapper ---------------------------
    #   Weff = Wg @ [Wm | Wv],  beff = bg @ [Wm | Wv] + [bm | bv]
    # Valid because new_graph_proj -> R_mean/R_var is purely affine in the
    # PyTorch module (no activation / LayerNorm in between).
    Wmv = jnp.concatenate([params["Wm"], params["Wv"]], axis=1)       # [H, 2L]
    bmv = jnp.concatenate([params["bm"], params["bv"]], axis=1)       # [1, 2L]
    Weff = (params["Wg"] @ Wmv).astype(mxu_dtype)                     # [GH, 2L]
    beff = (params["bg"] @ Wmv + bmv).astype(jnp.float32)             # [1, 2L]

    gf2 = graph_feats_all.reshape(BQ, GH).astype(mxu_dtype)           # [BQ, GH]
    txt = text_input.astype(mxu_dtype)                                # [B, TH]
    Wt = params["Wt"].astype(mxu_dtype)                               # [TH, L]
    bt = params["bt"].astype(jnp.float32)                             # [1, L]
    eps = eps.astype(jnp.float32)                                     # [BQ, L]

    PACK = _round_up(2 * L + 1, 128)   # lane-dense packed output width

    # ---- advisory cost estimate ----------------------------------------------
    isz = jnp.dtype(mxu_dtype).itemsize
    flops = 2 * BQ * GH * (2 * L) + 2 * B * TH * L + 10 * BQ * L
    transcendentals = BQ * L
    bytes_accessed = (isz * (BQ * GH + GH * 2 * L + B * TH + TH * L)
                      + 4 * (2 * L + L + BQ * L + B * PACK))

    # ---- VMEM budget: double-buffered tiles + resident weights + headroom ----
    # Sized against v7x's 32 MiB scoped default (64 MiB physical); plenty of
    # margin for Mosaic-internal scratch at these shapes.
    est = (2 * _pad_tile_bytes(TB * Q, GH, isz)      # gf tile (double-buffered)
           + 2 * _pad_tile_bytes(TB * Q, L, 4)       # eps tile
           + 2 * _pad_tile_bytes(TB, TH, isz)        # text tile
           + 2 * _pad_tile_bytes(TB, PACK, 4)        # packed output tile
           + 2 * _pad_tile_bytes(GH, 2 * L, isz)     # Weff (resident; 2x to be safe)
           + 2 * _pad_tile_bytes(1, 2 * L, 4)        # beff
           + 2 * _pad_tile_bytes(TH, L, isz)         # Wt
           + 2 * _pad_tile_bytes(1, L, 4))           # bt
    vmem_limit = int(min(max(2 * est + (4 << 20), 8 << 20), 32 << 20))

    packed = pl.pallas_call(
        functools.partial(_hiervae_latent_kernel, TB, Q, L),
        grid=grid,
        in_specs=[
            pl.BlockSpec((TB * Q, GH), lambda i: (i, 0)),   # gf rows (tiled)
            pl.BlockSpec((GH, 2 * L), lambda i: (0, 0)),    # Weff (VMEM-resident)
            pl.BlockSpec((1, 2 * L), lambda i: (0, 0)),     # beff (resident)
            pl.BlockSpec((TB * Q, L), lambda i: (i, 0)),    # eps rows (tiled)
            pl.BlockSpec((TB, TH), lambda i: (i, 0)),       # text rows (tiled)
            pl.BlockSpec((TH, L), lambda i: (0, 0)),        # Wt (resident)
            pl.BlockSpec((1, L), lambda i: (0, 0)),         # bt (resident)
        ],
        out_specs=pl.BlockSpec((TB, PACK), lambda i: (i, 0)),
        out_shape=jax.ShapeDtypeStruct((B, PACK), jnp.float32),
        compiler_params=pltpu.CompilerParams(
            dimension_semantics=("parallel",),
            vmem_limit_bytes=vmem_limit),
        cost_estimate=pl.CostEstimate(flops=flops,
                                      transcendentals=transcendentals,
                                      bytes_accessed=bytes_accessed),
    )(gf2, Weff, beff, eps, txt, Wt, bt)

    root = packed[:, :L]
    trep = packed[:, L:2 * L]
    kl = (-0.5 / float(B)) * jnp.sum(packed[:, 2 * L])
    return root, kl, trep


def _reference(graph_feats_all, text_input, params, eps):
    """Unfolded f32 reference matching the PyTorch two-matmul / two-exp chain."""
    B, Q, GH = graph_feats_all.shape
    gf2 = graph_feats_all.reshape(B * Q, GH)
    rv = gf2 @ params["Wg"] + params["bg"]
    zm = rv @ params["Wm"] + params["bm"]
    zlv = -jnp.abs(rv @ params["Wv"] + params["bv"])
    kl = -0.5 * jnp.sum(1.0 + zlv - zm * zm - jnp.exp(zlv)) / B
    z = zm + jnp.exp(zlv * 0.5) * eps
    root = z.reshape(B, Q, -1).mean(axis=1)
    trep = text_input @ params["Wt"] + params["bt"]
    return root, kl, trep


def _check(root, kl, trep, r_root, r_kl, r_trep, tol=1e-4):
    np.testing.assert_allclose(np.asarray(root), np.asarray(r_root), rtol=tol, atol=tol)
    np.testing.assert_allclose(np.asarray(kl), np.asarray(r_kl), rtol=tol, atol=tol)
    np.testing.assert_allclose(np.asarray(trep), np.asarray(r_trep), rtol=tol, atol=tol)


if __name__ == "__main__":
    # Module-consistent small shapes:
    #   num_query_tokens Q=8, graph_hidden GH=128, hidden_size H=64,
    #   latent_size L=32, text_hidden TH=64.
    Q, GH, H, L, TH = 8, 128, 64, 32, 64

    key = jax.random.PRNGKey(0)
    ks = jax.random.split(key, 16)

    params = {
        # new_graph_proj: Linear(graph_hidden, hidden_size)  -> stored [GH, H]
        "Wg": 0.05 * jax.random.normal(ks[0], (GH, H), jnp.float32),
        "bg": 0.05 * jax.random.normal(ks[1], (1, H), jnp.float32),
        # R_mean: Linear(hidden_size, latent_size)            -> stored [H, L]
        "Wm": 0.05 * jax.random.normal(ks[2], (H, L), jnp.float32),
        "bm": 0.05 * jax.random.normal(ks[3], (1, L), jnp.float32),
        # R_var: Linear(hidden_size, latent_size)             -> stored [H, L]
        "Wv": 0.05 * jax.random.normal(ks[4], (H, L), jnp.float32),
        "bv": 0.05 * jax.random.normal(ks[5], (1, L), jnp.float32),
        # new_text_proj: Linear(text_hidden, latent_size)     -> stored [TH, L]
        "Wt": 0.05 * jax.random.normal(ks[6], (TH, L), jnp.float32),
        "bt": 0.05 * jax.random.normal(ks[7], (1, L), jnp.float32),
    }

    # ---- Test 1: original toy shapes (single grid step) ----------------------
    B1 = 2
    gf1 = jax.random.normal(ks[8], (B1, Q, GH), jnp.float32)
    txt1 = jax.random.normal(ks[9], (B1, TH), jnp.float32)
    eps1 = jax.random.normal(ks[10], (B1 * Q, L), jnp.float32)

    root1, kl1, trep1 = hiervae_latent(gf1, txt1, params, eps1)
    jax.block_until_ready((root1, kl1, trep1))
    _check(root1, kl1, trep1, *_reference(gf1, txt1, params, eps1))

    # ---- Test 2: exercise the multi-step grid (resident weights, parallel ----
    # row axis, per-tile kl partials): B=16, 64 rows per tile -> grid=(2,).
    B2 = 16
    gf2_ = jax.random.normal(ks[11], (B2, Q, GH), jnp.float32)
    txt2 = jax.random.normal(ks[12], (B2, TH), jnp.float32)
    eps2 = jax.random.normal(ks[13], (B2 * Q, L), jnp.float32)

    root2, kl2, trep2 = hiervae_latent(gf2_, txt2, params, eps2,
                                       max_rows_per_tile=64)
    jax.block_until_ready((root2, kl2, trep2))
    _check(root2, kl2, trep2, *_reference(gf2_, txt2, params, eps2))

    print("KERNEL_OK")
</pallas_src>

<mosaic_0001>
module attributes {stable_mosaic.version = 11 : i64} {
  func.func @_hiervae_latent_kernel(%arg0: i32, %arg1: memref<16x128xf32, #tpu.memory_space<vmem>>, %arg2: memref<128x64xf32, #tpu.memory_space<vmem>>, %arg3: memref<1x64xf32, #tpu.memory_space<vmem>>, %arg4: memref<16x32xf32, #tpu.memory_space<vmem>>, %arg5: memref<2x64xf32, #tpu.memory_space<vmem>>, %arg6: memref<64x32xf32, #tpu.memory_space<vmem>>, %arg7: memref<1x32xf32, #tpu.memory_space<vmem>>, %arg8: memref<2x128xf32, #tpu.memory_space<vmem>>) attributes {dimension_semantics = [#tpu.dimension_semantics<parallel>], iteration_bounds = array<i64: 1>, scalar_prefetch = 0 : i64, scratch_operands = 0 : i64, tpu.core_type = #tpu.core_type<tc>, window_params = [{transform_indices = @transform_0, window_bounds = array<i64: 16, 128>}, {pipeline_mode = #tpu.pipeline_mode<synchronous>, transform_indices = @transform_1, window_bounds = array<i64: 128, 64>}, {pipeline_mode = #tpu.pipeline_mode<synchronous>, transform_indices = @transform_2, window_bounds = array<i64: 1, 64>}, {transform_indices = @transform_3, window_bounds = array<i64: 16, 32>}, {transform_indices = @transform_4, window_bounds = array<i64: 2, 64>}, {pipeline_mode = #tpu.pipeline_mode<synchronous>, transform_indices = @transform_5, window_bounds = array<i64: 64, 32>}, {pipeline_mode = #tpu.pipeline_mode<synchronous>, transform_indices = @transform_6, window_bounds = array<i64: 1, 32>}, {transform_indices = @transform_7, window_bounds = array<i64: 2, 128>}]} {
    %c0 = arith.constant 0 : index
    %c0_0 = arith.constant 0 : index
    %0 = vector.load %arg1[%c0, %c0_0] : memref<16x128xf32, #tpu.memory_space<vmem>>, vector<16x128xf32>
    %c0_1 = arith.constant 0 : index
    %c0_2 = arith.constant 0 : index
    %1 = vector.load %arg2[%c0_1, %c0_2] : memref<128x64xf32, #tpu.memory_space<vmem>>, vector<128x64xf32>
    %cst = arith.constant dense<0.000000e+00> : vector<16x64xf32>
    %2 = tpu.matmul %0, %1, %cst {dimension_numbers = #tpu.dot_dimension_numbers<[1], [0], [0], [1], [0, 0, 1, 1], [], []>} : vector<16x128xf32>, vector<128x64xf32>, vector<16x64xf32> -> vector<16x64xf32>
    %c0_3 = arith.constant 0 : index
    %c0_4 = arith.constant 0 : index
    %3 = vector.load %arg3[%c0_3, %c0_4] : memref<1x64xf32, #tpu.memory_space<vmem>>, vector<1x64xf32>
    %4 = vector.broadcast %3 : vector<1x64xf32> to vector<16x64xf32>
    %5 = arith.addf %2, %4 : vector<16x64xf32>
    %6 = vector.extract_strided_slice %5 {offsets = [0, 0], sizes = [16, 32], strides = [1, 1]} : vector<16x64xf32> to vector<16x32xf32>
    %7 = vector.extract_strided_slice %5 {offsets = [0, 32], sizes = [16, 32], strides = [1, 1]} : vector<16x64xf32> to vector<16x32xf32>
    %8 = math.absf %7 : vector<16x32xf32>
    %cst_5 = arith.constant 0.000000e+00 : f32
    %9 = vector.broadcast %cst_5 : f32 to vector<16x32xf32>
    %10 = arith.subf %9, %8 : vector<16x32xf32>
    %cst_6 = arith.constant 5.000000e-01 : f32
    %11 = vector.broadcast %cst_6 : f32 to vector<16x32xf32>
    %12 = arith.mulf %11, %10 : vector<16x32xf32>
    %13 = math.exp %12 : vector<16x32xf32>
    %cst_7 = arith.constant 1.000000e+00 : f32
    %14 = vector.broadcast %cst_7 : f32 to vector<16x32xf32>
    %15 = arith.addf %14, %10 : vector<16x32xf32>
    %16 = arith.mulf %6, %6 : vector<16x32xf32>
    %17 = arith.subf %15, %16 : vector<16x32xf32>
    %18 = arith.mulf %13, %13 : vector<16x32xf32>
    %19 = arith.subf %17, %18 : vector<16x32xf32>
    %c0_8 = arith.constant 0 : index
    %c0_9 = arith.constant 0 : index
    %20 = vector.load %arg4[%c0_8, %c0_9] : memref<16x32xf32, #tpu.memory_space<vmem>>, vector<16x32xf32>
    %21 = arith.mulf %13, %20 : vector<16x32xf32>
    %22 = arith.addf %6, %21 : vector<16x32xf32>
    %23 = vector.shape_cast %22 : vector<16x32xf32> to vector<2x8x32xf32>
    %cst_10 = arith.constant dense<0.000000e+00> : vector<2x32xf32>
    %24 = vector.multi_reduction <add>, %23, %cst_10 [1] : vector<2x8x32xf32> to vector<2x32xf32>
    %cst_11 = arith.constant 8.000000e+00 : f32
    %25 = vector.broadcast %cst_11 : f32 to vector<2x32xf32>
    %26 = arith.divf %24, %25 : vector<2x32xf32>
    %27 = vector.shape_cast %19 : vector<16x32xf32> to vector<2x8x32xf32>
    %cst_12 = arith.constant dense<0.000000e+00> : vector<2x8xf32>
    %28 = vector.multi_reduction <add>, %27, %cst_12 [2] : vector<2x8x32xf32> to vector<2x8xf32>
    %cst_13 = arith.constant dense<0.000000e+00> : vector<2xf32>
    %29 = vector.multi_reduction <add>, %28, %cst_13 [1] : vector<2x8xf32> to vector<2xf32>
    %30 = vector.shape_cast %29 : vector<2xf32> to vector<2x1xf32>
    %c0_14 = arith.constant 0 : index
    %c0_15 = arith.constant 0 : index
    %31 = vector.load %arg5[%c0_14, %c0_15] : memref<2x64xf32, #tpu.memory_space<vmem>>, vector<2x64xf32>
    %c0_16 = arith.constant 0 : index
    %c0_17 = arith.constant 0 : index
    %32 = vector.load %arg6[%c0_16, %c0_17] : memref<64x32xf32, #tpu.memory_space<vmem>>, vector<64x32xf32>
    %cst_18 = arith.constant dense<0.000000e+00> : vector<2x32xf32>
    %33 = tpu.matmul %31, %32, %cst_18 {dimension_numbers = #tpu.dot_dimension_numbers<[1], [0], [0], [1], [0, 0, 1, 1], [], []>} : vector<2x64xf32>, vector<64x32xf32>, vector<2x32xf32> -> vector<2x32xf32>
    %c0_19 = arith.constant 0 : index
    %c0_20 = arith.constant 0 : index
    %34 = vector.load %arg7[%c0_19, %c0_20] : memref<1x32xf32, #tpu.memory_space<vmem>>, vector<1x32xf32>
    %35 = vector.broadcast %34 : vector<1x32xf32> to vector<2x32xf32>
    %36 = arith.addf %33, %35 : vector<2x32xf32>
    %37 = vector.shape_cast %30 : vector<2x1xf32> to vector<2x1xf32>
    %38 = vector.broadcast %37 : vector<2x1xf32> to vector<2x64xf32>
    %39 = tpu.concatenate %26, %36, %38 in 1 : vector<2x32xf32>, vector<2x32xf32>, vector<2x64xf32> -> vector<2x128xf32>
    %c0_21 = arith.constant 0 : index
    %c0_22 = arith.constant 0 : index
    %40 = vector.load %arg8[%c0_21, %c0_22] : memref<2x128xf32, #tpu.memory_space<vmem>>, vector<2x128xf32>
    tpu.vector_store %arg8[%c0_21, %c0_22], %39 {strides = array<i32>} : memref<2x128xf32, #tpu.memory_space<vmem>>, vector<2x128xf32>,
    return
  }
  func.func @transform_0(%arg0: i32) -> (i32, i32) {
    %c0_i32 = arith.constant 0 : i32
    %c0_i32_0 = arith.constant 0 : i32
    return %arg0, %c0_i32 : i32, i32
  }
  func.func @transform_1(%arg0: i32) -> (i32, i32) {
    %c0_i32 = arith.constant 0 : i32
    %c0_i32_0 = arith.constant 0 : i32
    %c0_i32_1 = arith.constant 0 : i32
    return %c0_i32, %c0_i32_0 : i32, i32
  }
  func.func @transform_2(%arg0: i32) -> (i32, i32) {
    %c0_i32 = arith.constant 0 : i32
    %c0_i32_0 = arith.constant 0 : i32
    %c0_i32_1 = arith.constant 0 : i32
    return %c0_i32, %c0_i32_0 : i32, i32
  }
  func.func @transform_3(%arg0: i32) -> (i32, i32) {
    %c0_i32 = arith.constant 0 : i32
    %c0_i32_0 = arith.constant 0 : i32
    return %arg0, %c0_i32 : i32, i32
  }
  func.func @transform_4(%arg0: i32) -> (i32, i32) {
    %c0_i32 = arith.constant 0 : i32
    %c0_i32_0 = arith.constant 0 : i32
    return %arg0, %c0_i32 : i32, i32
  }
  func.func @transform_5(%arg0: i32) -> (i32, i32) {
    %c0_i32 = arith.constant 0 : i32
    %c0_i32_0 = arith.constant 0 : i32
    %c0_i32_1 = arith.constant 0 : i32
    return %c0_i32, %c0_i32_0 : i32, i32
  }
  func.func @transform_6(%arg0: i32) -> (i32, i32) {
    %c0_i32 = arith.constant 0 : i32
    %c0_i32_0 = arith.constant 0 : i32
    %c0_i32_1 = arith.constant 0 : i32
    return %c0_i32, %c0_i32_0 : i32, i32
  }
  func.func @transform_7(%arg0: i32) -> (i32, i32) {
    %c0_i32 = arith.constant 0 : i32
    %c0_i32_0 = arith.constant 0 : i32
    return %arg0, %c0_i32 : i32, i32
  }
}

</mosaic_0001>

<bundles_post_ra>
// kernel: tpu_custom_call.1
= control target key start
LH: loop header
LB: loop body
LE: loop exit
PB: predicated region body
PF: predicated region fallthrough
CT: control target
= control target key end

     0   :  { %s682_s0 = inlined_call_operand.vmem [shape: f32[16,128], index: 0, kind: input, shape index: {}]   ;;  %s683_s1 = inlined_call_operand.vmem [shape: f32[128,64], index: 1, kind: input, shape index: {}]   ;;  %s684_s2 = inlined_call_operand.vmem [shape: f32[1,64], index: 2, kind: input, shape index: {}]   ;;  %s685_s3 = inlined_call_operand.vmem [shape: f32[16,32], index: 3, kind: input, shape index: {}]   ;;  %s686_s4 = inlined_call_operand.vmem [shape: f32[2,64], index: 4, kind: input, shape index: {}]   ;;  %s687_s5 = inlined_call_operand.vmem [shape: f32[64,32], index: 5, kind: input, shape index: {}]   ;;  %s688_s6 = inlined_call_operand.vmem [shape: f32[1,32], index: 6, kind: input, shape index: {}]   ;;  %s689_s7 = inlined_call_operand.hbm [shape: f32[2,128], index: 7, kind: output, shape index: {}]  }
   0x1   :  { %v29_v0 = vld [vmem:[%s683_s1] sm:$0xff]  ;;  %v30_v1 = vld [vmem:[%s683_s1 + $0x8] sm:$0xff]  ;;  %v31_v2 = vld [vmem:[%s683_s1 + $0x10] sm:$0xff] }
   0x2   :  { %v427_v3 = vpack.c.bf16 %v30_v1, %v29_v0  ;;  %v32_v4 = vld [vmem:[%s683_s1 + $0x18] sm:$0xff]  ;;  %v33_v6 = vld [vmem:[%s683_s1 + $0x20] sm:$0xff]  ;;  %v34_v7 = vld [vmem:[%s683_s1 + $0x28] sm:$0xff] }
   0x3   :  { %v431_v5 = vpack.c.bf16 %v32_v4, %v31_v2  ;;  %v435_v8 = vpack.c.bf16 %v34_v7, %v33_v6  ;;  %v27_v9 = vld [vmem:[%s682_s0] sm:$0xff]  ;;  %v35_v10 = vld [vmem:[%s683_s1 + $0x30] sm:$0xff]  ;;  %v36_v11 = vld [vmem:[%s683_s1 + $0x38] sm:$0xff] }
   0x4   :  { %428 = vmatprep.subr.bf16.mxu0 %v427_v3  ;;  %405 = vmatprep.mubr.f32.mxu0 %v27_v9 }
   0x5   :  { %430 = vmatpush3.bf16.msra.mxu0 %v427_v3 }
   0x6   :  { %432 = vmatprep.subr.bf16.mxu0 %v431_v5 }
   0x7   :  { %12 = vsyncpa [#allocation3], 0  ;;  %v439_v12 = vpack.c.bf16 %v36_v11, %v35_v10  ;;  %v37_v13 = vld [vmem:[%s683_s1 + $0x40] sm:$0xff]  ;;  %v38_v14 = vld [vmem:[%s683_s1 + $0x48] sm:$0xff]  ;;  %v505_v33 = vmov 0.0|0.0   ;;  %vm506_vm0 = vmmov 0  }
   0x8   :  { %v443_v15 = vpack.c.bf16 %v38_v14, %v37_v13  ;;  %v39_v16 = vld [vmem:[%s683_s1 + $0x50] sm:$0xff]  ;;  %v40_v17 = vld [vmem:[%s683_s1 + $0x58] sm:$0xff]  ;;  %v41_v19 = vld [vmem:[%s683_s1 + $0x60] sm:$0xff]  ;;  %459 = vmatprep.subr.bf16.mxu1 %v505_v33  ;;  %v507_v36 = vmov 0.0   ;;  %s508_s25 = smov 32   ;;  %vm244_vm1 = vcmask 523264  }
   0x9   :  { %434 = vmatpush3.bf16.msra.mxu0 %v431_v5  ;;  %v447_v18 = vpack.c.bf16 %v40_v17, %v39_v16  ;;  %v42_v20 = vld [vmem:[%s683_s1 + $0x68] sm:$0xff]  ;;  %v43_v22 = vld [vmem:[%s683_s1 + $0x70] sm:$0xff]  ;;  %v44_v23 = vld [vmem:[%s683_s1 + $0x78] sm:$0xff]  ;;  %424 = vmatprep.mubr.msk.f32.mxu1 %vm506_vm0, %v507_v36  ;;  %vm177_vm2 = vcmask 261120   ;;  %vm221_vm3 = vcmask 1041409   ;;  %vm224_vm4 = vcmask 58368  }
   0xa   :  { %436 = vmatprep.subr.bf16.mxu0 %v435_v8  ;;  %v451_v21 = vpack.c.bf16 %v42_v20, %v41_v19  ;;  %v455_v24 = vpack.c.bf16 %v44_v23, %v43_v22  ;;  %v28_v25 = vld [vmem:[%s682_s0 + $0x8] sm:$0xff]  ;;  %v343_v26 = vld [vmem:[%s684_s2] ss:$0 sm:$0xff]  ;;  %v231_v31 = vld [vmem:[%s687_s5 + $0x10] sm:$0xff]  ;;  %v211_v20 = vlaneseq }
   0xb   :  { %v229_v29 = vld [vmem:[%s687_s5] sm:$0xff]  ;;  %v230_v30 = vld [vmem:[%s687_s5 + $0x8] sm:$0xff]  ;;  %v232_v35 = vld [vmem:[%s687_s5 + $0x18] sm:$0xff] }
   0xc   :  { %v460_v34 = vpack.c.bf16 %v230_v30, %v229_v29  ;;  %v463_v39 = vpack.c.bf16 %v232_v35, %v231_v31  ;;  %v233_v40 = vld [vmem:[%s687_s5 + $0x20] sm:$0xff]  ;;  %v234_v41 = vld [vmem:[%s687_s5 + $0x28] sm:$0xff]  ;;  %v235_v44 = vld [vmem:[%s687_s5 + $0x30] sm:$0xff]  ;;  %v214_v22 = vshrl.u32 %v211_v20, 7 }
   0xd   :  { %438 = vmatpush3.bf16.msra.mxu0 %v435_v8  ;;  %v466_v43 = vpack.c.bf16 %v234_v41, %v233_v40  ;;  %v236_v45 = vld [vmem:[%s687_s5 + $0x38] sm:$0xff]  ;;  %v228_v47 = vld [vmem:[%s686_s4] sm:$0x3]  ;;  %s509_s4 = smov 96   ;;  %v156_v8 = vld [vmem:[%s685_s3 + $0x8] sm:$0xff] }
   0xe   :  { %440 = vmatprep.subr.bf16.mxu0 %v439_v12  ;;  %461 = vmatpush3.bf16.msra.mxu1 %v460_v34  ;;  %v469_v46 = vpack.c.bf16 %v236_v45, %v235_v44  ;;  %v155_v9 = vld [vmem:[%s685_s3] sm:$0xff]  ;;  %s510_s3 = smov [#allocation2]  }
   0xf   :  { %462 = vmatprep.subr.bf16.mxu1 %v505_v33  ;;  %v344_v17 = vld [vmem:[%s688_s6] ss:$0 sm:$0xff]  ;;  %s335_s6 = sshll.u32 %s510_s3, 4  ;;  %s336_s6 = int_to_ptr.vmem [resolvable:$true] %s335_s6 }
  0x10   :  { %s481_s14 = scalar_lea.vmem %s336_s6, 32  ;;  %p486_p1 = scmp.lt.s32.totalorder %s336_s6, %s336_s6 }
  0x11   :  { %442 = vmatpush3.bf16.msra.mxu0 %v439_v12  ;;  %p482_p0 = scmp.ne.s32.totalorder %s336_s6, %s481_s14  ;;  %p487_p2 = scmp.lt.s32.totalorder %s481_s14, %s481_s14 }
  0x12   :  { %444 = vmatprep.subr.bf16.mxu0 %v443_v15  ;;  %464 = vmatpush3.bf16.msra.mxu1 %v463_v39 }
  0x13   :  { %465 = vmatprep.subr.bf16.mxu1 %v505_v33  ;;  %p488_p3 = por %p487_p2, %p486_p1 }
  0x15   :  { %446 = vmatpush3.bf16.msra.mxu0 %v443_v15  ;;  %p489_p4 = pnand %p488_p3, %p482_p0 }
  0x16   :  { %448 = vmatprep.subr.bf16.mxu0 %v447_v18  ;;  %467 = vmatpush3.bf16.msra.mxu1 %v466_v43 }
  0x17   :  { %468 = vmatprep.subr.bf16.mxu1 %v505_v33 }
  0x19   :  { %450 = vmatpush3.bf16.msra.mxu0 %v447_v18 }
  0x1a   :  { %452 = vmatprep.subr.bf16.mxu0 %v451_v21  ;;  %470 = vmatpush3.bf16.msra.mxu1 %v469_v46 }
  0x1d   :  { %454 = vmatpush3.bf16.msra.mxu0 %v451_v21  ;;  %425 = vmatmul.mubr.msk.f32.vlgmr.msra.gmra.mrb[0].mxu1 %vm244_vm1, %v228_v47  ;;  %v212_v21 = vand.u32 127, %v211_v20 }
  0x1e   :  { %456 = vmatprep.subr.bf16.mxu0 %v455_v24 }
  0x1f   :  { %v215_v23 = vsub.s32 %v212_v21, %v214_v22 }
  0x21   :  { %458 = vmatpush3.bf16.msra.mxu0 %v455_v24 }
  0x24   :  { %406 = vmatmul.mubr.f32.vlgmr.msra.gmra.mrb[0].mxu0 %v28_v25 }
  0xf0   :  { %v314_v10 = vpop.f32.mrb[0].mxu1 }
  0xf1   :  { %v426_v11 = vpop.f32.mrb[1].mxu1  ;;  %v315_v19 = vadd.f32 %v344_v17, %v314_v10 }
  0xf7   :  { %v407_v27 = vpop.f32.mrb[0].mxu0 }
  0xf8   :  { %v118_v28 = vpop.f32.mrb[1].mxu0  ;;  %v622_v37 = vadd.f32 %v407_v27, %v343_v26 }
  0xf9   :  { %v617_v32 = vadd.f32 %v343_v26, %v118_v28 }
  0xfa   :  { %v140_v42 = vmul.f32 %v622_v37, %v622_v37  ;;  %v128_v50 = vand.u32 2147483647, %v622_v37 }
  0xfb   :  { %v139_v38 = vmul.f32 %v617_v32, %v617_v32  ;;  %v127_v48 = vand.u32 2147483647, %v617_v32 }
  0xfc   :  { %v130_v52 = vsub.f32 0.0, %v128_v50 }
  0xfd   :  { %143 = vrot.lane.b32.xlu0 %v139_v38, %s508_s25  ;;  %v129_v49 = vsub.f32 0.0, %v127_v48 }
  0xfe   :  { %v132_v54 = vmul.f32 0.5, %v130_v52  ;;  %v138_v62 = vadd.f32 1.0, %v130_v52 }
  0xff   :  { %v131_v51 = vmul.f32 0.5, %v129_v49  ;;  %v137_v57 = vadd.f32 1.0, %v129_v49 }
 0x100   :  { %v135_v55 = vmul.f32 1.442695, %v132_v54 }
 0x101   :  { %145 = vrot.lane.b32.xlu0 %v140_v42, %s508_s25  ;;  %v133_v53 = vmul.f32 1.442695, %v131_v51 }
 0x103   :  { %477 = vpow2.f32 %v133_v53 }
 0x104   :  { %479 = vpow2.f32 %v135_v55 }
 0x10d   :  { %v478_v56 = vpop.eup %477 }
 0x10e   :  { %v151_v60 = vmul.f32 %v478_v56, %v478_v56  ;;  %v480_v61 = vpop.eup %479 }
 0x10f   :  { %v152_v1 = vmul.f32 %v480_v61, %v480_v61 }
 0x16f   :  { %v144_v58 = vpop.permute.xlu0 %143 }
 0x170   :  { %v149_v59 = vsub.f32 %v137_v57, %v144_v58 }
 0x172   :  { %v153_v63 = vsub.f32 %v149_v59, %v151_v60 }
 0x173   :  { %v146_v0 = vpop.permute.xlu0 %145 }
 0x174   :  { %v150_v2 = vsub.f32 %v138_v62, %v146_v0  ;;  %197 = vrot.lane.b32.xlu1 %v153_v63, %s509_s4 }
 0x176   :  { %v154_v3 = vsub.f32 %v150_v2, %v152_v1 }
 0x178   :  { %199 = vrot.lane.b32.xlu1 %v154_v3, %s509_s4 }
 0x1e6   :  { %v198_v4 = vpop.permute.xlu1 %197 }
 0x1e7   :  { %v203_v5 = vsel %vm177_vm2, %v198_v4, 0.0 }
 0x1e8   :  { %204 = vadd.xlane.f32.xlu0 %v203_v5 }
 0x1ea   :  { %v200_v6 = vpop.permute.xlu1 %199 }
 0x1eb   :  { %v206_v7 = vsel %vm177_vm2, %v200_v6, 0.0 }
 0x1ec   :  { %207 = vadd.xlane.f32.xlu1 %v206_v7 }
 0x1fd   :  { %161 = vrot.lane.b32.xlu1 %v156_v8, %s508_s25 }
 0x1fe   :  { %159 = vrot.lane.b32.xlu0 %v155_v9, %s508_s25 }
 0x275   :  { %v205_v12 = vpop.xlane.xlu0 %204 }
 0x276   :  { %v216_v25 = vrot.slane %v205_v12, %v215_v23 }
 0x279   :  { %v160_v13 = vpop.permute.xlu0 %159  ;;  %v208_v14 = vpop.xlane.xlu1 %207 }
 0x27a   :  { %v165_v15 = vmul.f32 %v478_v56, %v160_v13  ;;  %v220_v24 = vrot.slane %v208_v14, %v215_v23 }
 0x27c   :  { %169 = vrot.lane.b32.xlu0 %v165_v15, %s509_s4  ;;  %v222_v26 = vsel %vm221_vm3, %v220_v24, %v216_v25 }
 0x27d   :  { %v162_v16 = vpop.permute.xlu1 %161  ;;  %v225_v27 = vsel %vm224_vm4, %v222_v26, 0.0 }
 0x27e   :  { %v166_v18 = vmul.f32 %v480_v61, %v162_v16 }
 0x280   :  { %171 = vrot.lane.b32.xlu1 %v166_v18, %s509_s4 }
 0x284   :  { %323 = vrot.lane.b32.xlu1 %v315_v19, %s508_s25 }
 0x29b   :  { %226 = vadd.xlane.f32.xlu0 %v225_v27 }
 0x2ee   :  { %v170_v29 = vpop.permute.xlu0 %169 }
 0x2ef   :  { %v175_v31 = vadd.f32 %v170_v29, %v617_v32 }
 0x2f1   :  { %v178_v34 = vsel %vm177_vm2, %v175_v31, 0.0 }
 0x2f2   :  { %v172_v28 = vpop.permute.xlu1 %171  ;;  %v179_v36 = vrot.slane %v178_v34, 4 }
 0x2f3   :  { %v176_v30 = vadd.f32 %v172_v28, %v622_v37 }
 0x2f4   :  { %v180_v39 = vadd.f32 %v179_v36, %v178_v34 }
 0x2f5   :  { %v185_v33 = vsel %vm177_vm2, %v176_v30, 0.0 }
 0x2f6   :  { %v186_v35 = vrot.slane %v185_v33, 4  ;;  %v181_v41 = vrot.slane %v180_v39, 2  ;;  %v324_v49 = vpop.permute.xlu1 %323 }
 0x2f8   :  { %v187_v38 = vadd.f32 %v186_v35, %v185_v33  ;;  %v182_v43 = vadd.f32 %v181_v41, %v180_v39 }
 0x2fa   :  { %v188_v40 = vrot.slane %v187_v38, 2  ;;  %v183_v45 = vrot.slane %v182_v43, 1 }
 0x2fc   :  { %v189_v42 = vadd.f32 %v188_v40, %v187_v38  ;;  %v184_v47 = vadd.f32 %v183_v45, %v182_v43 }
 0x2fe   :  { %v190_v44 = vrot.slane %v189_v42, 1  ;;  %v193_v37 = vmul.f32 0.125, %v184_v47 }
 0x300   :  { %v191_v46 = vadd.f32 %v190_v44, %v189_v42 }
 0x302   :  { %v194_v48 = vmul.f32 0.125, %v191_v46 }
 0x304   :  { %v320_v32 = vsel %vm221_vm3, %v194_v48, %v193_v37 }
 0x305   :  { %v326_v50 = vsel %vm177_vm2, %v320_v32, %v324_v49 }
 0x328   :  { %v227_v51 = vpop.xlane.xlu0 %226 }
 0x329   :  { %v327_v52 = vsel %vm244_vm1, %v326_v50, %v227_v51 }
 0x32a   :  { %328 = vst [vmem:[#allocation2] sm:$0x3] %v327_v52 }
 0x32b   :  { %492 = shalt.err (!%p489_p4)
}
 0x32c   :  { %s493_s17 = scalar_lea.hbm %s689_s7, 32 }
 0x32d   :  { %p494_p5 = scmp.ne.s32.totalorder %s689_s7, %s493_s17  ;;  %p497_p6 = scmp.lt.u32.totalorder %s493_s17, %s689_s7 }
 0x32f   :  { %p499_p7 = pnand %p497_p6, %p494_p5 }
 0x331   :  { %502 = shalt.err (!%p499_p7)
}
 0x332   :  { %338 = dma.vmem_to_hbm [thread:$0]  %s336_s6, 32, %s689_s7, [#allocation3]  }
 0x333   :  { %503 = dma.done.wait [#allocation3], 32  }
 0x334   :  { %504 = vsyncadd [#allocation3], 4294967264 }
 0x335   :  { %342 = vsyncpa [#allocation3], 1 }

</bundles_post_ra>
